<compile_context>
chip_gen: v6e
topology: v6e:2x2x1
jax: 0.10.0
libtpu: 0.0.40
codegen_flags: <defaults>
</compile_context>

<pallas_src>
import math

import jax
import jax.numpy as jnp
from jax import lax
from jax.experimental import pallas as pl
from jax.experimental.pallas import tpu as pltpu


def _round_up(x: int, m: int) -> int:
    return ((x + m - 1) // m) * m


def build_kernel(num_layers: int, T: int, B: int):
    """Builds the Pallas kernel for a given (static) number of RNN layers.

    Argument layout (all VMEM refs, already padded & transposed by wrapper):
      x        [T*B, I]   time-major input, flattened over (T, B)
      lengths  [B, 1]     int32 sequence lengths (0 for padded batch rows)
      wih0     [I, H]     layer-0 input weights (transposed)
      whh0     [H, H]     layer-0 hidden weights (transposed)
      b0       [1, H]     layer-0 bias (b_ih + b_hh)
      for l in 1..L-1:
        wstk_l [2H, H]    stacked [Wih_l ; Whh_l] (transposed)
        b_l    [1, H]
      wfc      [H, O]     Linear weight with eval-BatchNorm folded in
      bfc      [1, O]     Linear bias with eval-BatchNorm folded in (-1e30 pad)
      out      [B, O]
      xproj    [T*B, H]   scratch: precomputed layer-0 input projection
    """

    def kernel(*refs):
        x_ref, len_ref, wih0_ref, whh0_ref, b0_ref = refs[:5]
        idx = 5
        wstk, bstk = [], []
        for _ in range(num_layers - 1):
            wstk.append(refs[idx])
            bstk.append(refs[idx + 1])
            idx += 2
        wfc_ref, bfc_ref, out_ref, xproj_ref = refs[idx:idx + 4]

        H = whh0_ref.shape[0]

        # --- Hoisted layer-0 input projection (+ bias): one well-utilized MXU
        # op covering all T timesteps, off the serial recurrence path.
        xproj_ref[...] = (
            jnp.dot(x_ref[...], wih0_ref[...], preferred_element_type=jnp.float32)
            + b0_ref[...])

        # Hoist loop-invariant loads out of the recurrence.
        lengths = len_ref[...]                       # [B, 1] int32
        whh0 = whh0_ref[...]
        wstk_v = [w[...] for w in wstk]
        bstk_v = [b[...] for b in bstk]

        # --- RNN recurrence with pack_padded_sequence masking.  One MXU push
        # per layer per step on the dependency chain.
        def step(t, carry):
            hs = list(carry)
            mask = t < lengths                       # [B, 1] bool
            off = pl.multiple_of(t * B, B)
            x_t = xproj_ref[pl.ds(off, B), :]        # [B, H]: proj + bias, precomputed
            pre0 = x_t + jnp.dot(hs[0], whh0, preferred_element_type=jnp.float32)
            h0 = jnp.where(mask, jnp.tanh(pre0), hs[0])   # freeze past seq end
            new_hs = [h0]
            inp = h0
            for l in range(1, num_layers):
                cat = jnp.concatenate([inp, hs[l]], axis=1)          # [B, 2H]
                pre = (jnp.dot(cat, wstk_v[l - 1],
                               preferred_element_type=jnp.float32)
                       + bstk_v[l - 1])
                h_l = jnp.where(mask, jnp.tanh(pre), hs[l])
                new_hs.append(h_l)
                inp = h_l
            return tuple(new_hs)

        h_init = tuple(jnp.zeros((B, H), jnp.float32) for _ in range(num_layers))
        # Fully unrolled: T is small and static; gives the scheduler full
        # visibility to overlap MXU latency with VPU/EUP work of nearby steps.
        h_final = lax.fori_loop(0, T, step, h_init, unroll=True)[num_layers - 1]

        # --- Classifier. BatchNorm (eval) already folded into wfc/bfc in the
        # wrapper; Dropout is identity in eval mode.
        logits = (jnp.dot(h_final, wfc_ref[...], preferred_element_type=jnp.float32)
                  + bfc_ref[...])
        m = jnp.max(logits, axis=1, keepdims=True)
        z = logits - m
        lse = jnp.log(jnp.sum(jnp.exp(z), axis=1, keepdims=True))
        out_ref[...] = z - lse                       # lane-dense [B, O] store

    return kernel


def init_params(key, input_size, hidden_size, output_size, num_layers=1):
    """Deterministic PyTorch-style init (uniform(-1/sqrt(H), 1/sqrt(H)))."""
    n_keys = 4 * num_layers + 2
    keys = jax.random.split(key, n_keys)
    k_rnn = 1.0 / math.sqrt(hidden_size)
    wih, whh, b_ih, b_hh = [], [], [], []
    i = 0
    for l in range(num_layers):
        in_dim = input_size if l == 0 else hidden_size
        wih.append(jax.random.uniform(keys[i], (hidden_size, in_dim), jnp.float32, -k_rnn, k_rnn)); i += 1
        whh.append(jax.random.uniform(keys[i], (hidden_size, hidden_size), jnp.float32, -k_rnn, k_rnn)); i += 1
        b_ih.append(jax.random.uniform(keys[i], (hidden_size,), jnp.float32, -k_rnn, k_rnn)); i += 1
        b_hh.append(jax.random.uniform(keys[i], (hidden_size,), jnp.float32, -k_rnn, k_rnn)); i += 1
    k_fc = 1.0 / math.sqrt(hidden_size)
    wfc = jax.random.uniform(keys[i], (output_size, hidden_size), jnp.float32, -k_fc, k_fc); i += 1
    bfc = jax.random.uniform(keys[i], (output_size,), jnp.float32, -k_fc, k_fc)
    return dict(
        wih=wih, whh=whh, b_ih=b_ih, b_hh=b_hh,
        gamma=jnp.ones((hidden_size,), jnp.float32),
        beta=jnp.zeros((hidden_size,), jnp.float32),
        running_mean=jnp.zeros((hidden_size,), jnp.float32),
        running_var=jnp.ones((hidden_size,), jnp.float32),
        wfc=wfc, b_fc=bfc,
    )


def batch_char_rnn_forward(input_seq, seq_lengths, params, eps=1e-5):
    """input_seq: [B, T, I] f32; seq_lengths: [B] int (sorted descending)."""
    B, T, I = input_seq.shape
    H = params["whh"][0].shape[0]
    O = params["wfc"].shape[0]
    L = len(params["wih"])

    # Tile-friendly padding: batch -> multiple of 8 sublanes, hidden/output ->
    # multiple of 128 lanes (unmasked vector ops, lane-dense output store).
    Bp = max(_round_up(B, 8), 8)
    Hp = _round_up(H, 128)
    Op = _round_up(O, 128)
    NEG = jnp.float32(-1e30)   # padded logit columns contribute ~0 softmax mass

    x = jnp.asarray(input_seq, jnp.float32)
    x = jnp.pad(x, ((0, Bp - B), (0, 0), (0, 0)))
    x_tm = jnp.transpose(x, (1, 0, 2)).reshape(T * Bp, I)    # time-major, flat

    lengths = jnp.zeros((Bp,), jnp.int32).at[:B].set(
        jnp.asarray(seq_lengths, jnp.int32)).reshape(Bp, 1)

    def pad2(w, r, c):
        return jnp.pad(w, ((0, r - w.shape[0]), (0, c - w.shape[1])))

    wih0 = pad2(params["wih"][0].T.astype(jnp.float32), I, Hp)          # [I, Hp]
    whh0 = pad2(params["whh"][0].T.astype(jnp.float32), Hp, Hp)         # [Hp, Hp]
    b0 = jnp.pad((params["b_ih"][0] + params["b_hh"][0]).astype(jnp.float32),
                 (0, Hp - H)).reshape(1, Hp)

    args = [x_tm, lengths, wih0, whh0, b0]
    for l in range(1, L):
        wih_l = pad2(params["wih"][l].T.astype(jnp.float32), Hp, Hp)
        whh_l = pad2(params["whh"][l].T.astype(jnp.float32), Hp, Hp)
        args.append(jnp.concatenate([wih_l, whh_l], axis=0))            # [2Hp, Hp]
        args.append(jnp.pad((params["b_ih"][l] + params["b_hh"][l]).astype(jnp.float32),
                            (0, Hp - H)).reshape(1, Hp))

    # Fold eval-mode BatchNorm1d into the Linear layer (affine constant).
    scale = params["gamma"] / jnp.sqrt(params["running_var"] + eps)     # [H]
    shift = params["beta"] - params["running_mean"] * scale             # [H]
    wfc_f = params["wfc"].T.astype(jnp.float32) * scale[:, None]        # [H, O]
    bfc_f = params["b_fc"].astype(jnp.float32) + shift @ params["wfc"].T.astype(jnp.float32)
    wfc_p = pad2(wfc_f, Hp, Op)
    bfc_p = jnp.full((1, Op), NEG, jnp.float32).at[0, :O].set(bfc_f)

    args += [wfc_p, bfc_p]

    kernel = build_kernel(L, T, Bp)
    out = pl.pallas_call(
        kernel,
        out_shape=jax.ShapeDtypeStruct((Bp, Op), jnp.float32),
        in_specs=[pl.BlockSpec(memory_space=pltpu.MemorySpace.VMEM)] * len(args),
        out_specs=pl.BlockSpec(memory_space=pltpu.MemorySpace.VMEM),
        scratch_shapes=[pltpu.VMEM((T * Bp, Hp), jnp.float32)],
    )(*args)
    return out[:B, :O]


def reference_forward(input_seq, seq_lengths, params, eps=1e-5):
    """Pure-JAX reference mirroring the PyTorch module (eval mode)."""
    B, T, I = input_seq.shape
    L = len(params["wih"])
    H = params["whh"][0].shape[0]
    hs = [jnp.zeros((B, H), jnp.float32) for _ in range(L)]
    lengths = jnp.asarray(seq_lengths, jnp.int32)[:, None]
    for t in range(T):
        mask = t < lengths
        inp = input_seq[:, t, :]
        for l in range(L):
            pre = (inp @ params["wih"][l].T + params["b_ih"][l]
                   + hs[l] @ params["whh"][l].T + params["b_hh"][l])
            hs[l] = jnp.where(mask, jnp.tanh(pre), hs[l])
            inp = hs[l]
    h = hs[-1]
    h = ((h - params["running_mean"]) / jnp.sqrt(params["running_var"] + eps)
         * params["gamma"] + params["beta"])
    logits = h @ params["wfc"].T + params["b_fc"]
    return jax.nn.log_softmax(logits, axis=1)


if __name__ == "__main__":
    # Small shapes consistent with the module's forward:
    #   batch=4, max_seq_len=8, input_size(N_LETTERS)=16, hidden=32, output=8
    B, T, I, H, O = 4, 8, 16, 32, 8
    NUM_LAYERS = 1  # module default

    key = jax.random.PRNGKey(0)
    k_param, k_data = jax.random.split(key)
    params = init_params(k_param, I, H, O, num_layers=NUM_LAYERS)

    input_seq = jax.random.normal(k_data, (B, T, I), jnp.float32)
    seq_lengths = jnp.array([8, 6, 3, 1], jnp.int32)  # sorted descending

    # Zero out padded positions (pack_padded_sequence ignores them anyway).
    t_ids = jnp.arange(T)[None, :, None]
    input_seq = jnp.where(t_ids < seq_lengths[:, None, None], input_seq, 0.0)

    out = batch_char_rnn_forward(input_seq, seq_lengths, params)
    out = jax.block_until_ready(out)
    ref = reference_forward(input_seq, seq_lengths, params)

    assert out.shape == (B, O)
    assert bool(jnp.all(jnp.isfinite(out)))
    assert bool(jnp.allclose(out, ref, atol=1e-3, rtol=1e-3))
    print("KERNEL_OK")
</pallas_src>

<mosaic_0001>
module attributes {stable_mosaic.version = 11 : i64} {
  func.func @kernel(%arg0: memref<64x16xf32, #tpu.memory_space<vmem>>, %arg1: memref<8x1xi32, #tpu.memory_space<vmem>>, %arg2: memref<16x128xf32, #tpu.memory_space<vmem>>, %arg3: memref<128x128xf32, #tpu.memory_space<vmem>>, %arg4: memref<1x128xf32, #tpu.memory_space<vmem>>, %arg5: memref<128x128xf32, #tpu.memory_space<vmem>>, %arg6: memref<1x128xf32, #tpu.memory_space<vmem>>, %arg7: memref<8x128xf32, #tpu.memory_space<vmem>>, %arg8: memref<64x128xf32, #tpu.memory_space<vmem>>) attributes {dimension_semantics = [], scalar_prefetch = 0 : i64, scratch_operands = 1 : i64, tpu.core_type = #tpu.core_type<tc>} {
    %c0 = arith.constant 0 : index
    %c0_0 = arith.constant 0 : index
    %0 = vector.load %arg0[%c0, %c0_0] : memref<64x16xf32, #tpu.memory_space<vmem>>, vector<64x16xf32>
    %c0_1 = arith.constant 0 : index
    %c0_2 = arith.constant 0 : index
    %1 = vector.load %arg2[%c0_1, %c0_2] : memref<16x128xf32, #tpu.memory_space<vmem>>, vector<16x128xf32>
    %cst = arith.constant dense<0.000000e+00> : vector<64x128xf32>
    %2 = tpu.matmul %0, %1, %cst {dimension_numbers = #tpu.dot_dimension_numbers<[1], [0], [0], [1], [0, 0, 1, 1], [], []>} : vector<64x16xf32>, vector<16x128xf32>, vector<64x128xf32> -> vector<64x128xf32>
    %c0_3 = arith.constant 0 : index
    %c0_4 = arith.constant 0 : index
    %3 = vector.load %arg4[%c0_3, %c0_4] : memref<1x128xf32, #tpu.memory_space<vmem>>, vector<1x128xf32>
    %4 = vector.broadcast %3 : vector<1x128xf32> to vector<64x128xf32>
    %5 = arith.addf %2, %4 : vector<64x128xf32>
    %c0_5 = arith.constant 0 : index
    %c0_6 = arith.constant 0 : index
    %6 = vector.load %arg8[%c0_5, %c0_6] : memref<64x128xf32, #tpu.memory_space<vmem>>, vector<64x128xf32>
    tpu.vector_store %arg8[%c0_5, %c0_6], %5 {strides = array<i32>} : memref<64x128xf32, #tpu.memory_space<vmem>>, vector<64x128xf32>,
    %c0_7 = arith.constant 0 : index
    %c0_8 = arith.constant 0 : index
    %7 = vector.load %arg1[%c0_7, %c0_8] : memref<8x1xi32, #tpu.memory_space<vmem>>, vector<8x1xi32>
    %c0_9 = arith.constant 0 : index
    %c0_10 = arith.constant 0 : index
    %8 = vector.load %arg3[%c0_9, %c0_10] : memref<128x128xf32, #tpu.memory_space<vmem>>, vector<128x128xf32>
    %cst_11 = arith.constant 0.000000e+00 : f32
    %9 = vector.broadcast %cst_11 : f32 to vector<8x128xf32>
    %c0_i32 = arith.constant 0 : i32
    %10 = vector.broadcast %c0_i32 : i32 to vector<8x1xi32>
    %11 = arith.cmpi slt, %10, %7 : vector<8x1xi32>
    %c8_i32 = arith.constant 8 : i32
    %12 = arith.muli %c0_i32, %c8_i32 : i32
    %13 = tpu.assume_multiple %12, 8 : i32
    %14 = arith.index_cast %13 : i32 to index
    %c0_12 = arith.constant 0 : index
    %15 = vector.load %arg8[%14, %c0_12] : memref<64x128xf32, #tpu.memory_space<vmem>>, vector<8x128xf32>
    %cst_13 = arith.constant dense<0.000000e+00> : vector<8x128xf32>
    %16 = tpu.matmul %9, %8, %cst_13 {dimension_numbers = #tpu.dot_dimension_numbers<[1], [0], [0], [1], [0, 0, 1, 1], [], []>} : vector<8x128xf32>, vector<128x128xf32>, vector<8x128xf32> -> vector<8x128xf32>
    %17 = arith.addf %15, %16 : vector<8x128xf32>
    %18 = math.tanh %17 : vector<8x128xf32>
    %19 = vector.shape_cast %11 : vector<8x1xi1> to vector<8x1xi1>
    %20 = vector.broadcast %19 : vector<8x1xi1> to vector<8x128xi1>
    %21 = arith.select %20, %18, %9 : vector<8x128xi1>, vector<8x128xf32>
    %c1_i32 = arith.constant 1 : i32
    %22 = vector.broadcast %c1_i32 : i32 to vector<8x1xi32>
    %23 = arith.cmpi slt, %22, %7 : vector<8x1xi32>
    %c8_i32_14 = arith.constant 8 : i32
    %24 = arith.muli %c1_i32, %c8_i32_14 : i32
    %25 = tpu.assume_multiple %24, 8 : i32
    %26 = arith.index_cast %25 : i32 to index
    %c0_15 = arith.constant 0 : index
    %27 = vector.load %arg8[%26, %c0_15] : memref<64x128xf32, #tpu.memory_space<vmem>>, vector<8x128xf32>
    %cst_16 = arith.constant dense<0.000000e+00> : vector<8x128xf32>
    %28 = tpu.matmul %21, %8, %cst_16 {dimension_numbers = #tpu.dot_dimension_numbers<[1], [0], [0], [1], [0, 0, 1, 1], [], []>} : vector<8x128xf32>, vector<128x128xf32>, vector<8x128xf32> -> vector<8x128xf32>
    %29 = arith.addf %27, %28 : vector<8x128xf32>
    %30 = math.tanh %29 : vector<8x128xf32>
    %31 = vector.shape_cast %23 : vector<8x1xi1> to vector<8x1xi1>
    %32 = vector.broadcast %31 : vector<8x1xi1> to vector<8x128xi1>
    %33 = arith.select %32, %30, %21 : vector<8x128xi1>, vector<8x128xf32>
    %c2_i32 = arith.constant 2 : i32
    %34 = vector.broadcast %c2_i32 : i32 to vector<8x1xi32>
    %35 = arith.cmpi slt, %34, %7 : vector<8x1xi32>
    %c8_i32_17 = arith.constant 8 : i32
    %36 = arith.muli %c2_i32, %c8_i32_17 : i32
    %37 = tpu.assume_multiple %36, 8 : i32
    %38 = arith.index_cast %37 : i32 to index
    %c0_18 = arith.constant 0 : index
    %39 = vector.load %arg8[%38, %c0_18] : memref<64x128xf32, #tpu.memory_space<vmem>>, vector<8x128xf32>
    %cst_19 = arith.constant dense<0.000000e+00> : vector<8x128xf32>
    %40 = tpu.matmul %33, %8, %cst_19 {dimension_numbers = #tpu.dot_dimension_numbers<[1], [0], [0], [1], [0, 0, 1, 1], [], []>} : vector<8x128xf32>, vector<128x128xf32>, vector<8x128xf32> -> vector<8x128xf32>
    %41 = arith.addf %39, %40 : vector<8x128xf32>
    %42 = math.tanh %41 : vector<8x128xf32>
    %43 = vector.shape_cast %35 : vector<8x1xi1> to vector<8x1xi1>
    %44 = vector.broadcast %43 : vector<8x1xi1> to vector<8x128xi1>
    %45 = arith.select %44, %42, %33 : vector<8x128xi1>, vector<8x128xf32>
    %c3_i32 = arith.constant 3 : i32
    %46 = vector.broadcast %c3_i32 : i32 to vector<8x1xi32>
    %47 = arith.cmpi slt, %46, %7 : vector<8x1xi32>
    %c8_i32_20 = arith.constant 8 : i32
    %48 = arith.muli %c3_i32, %c8_i32_20 : i32
    %49 = tpu.assume_multiple %48, 8 : i32
    %50 = arith.index_cast %49 : i32 to index
    %c0_21 = arith.constant 0 : index
    %51 = vector.load %arg8[%50, %c0_21] : memref<64x128xf32, #tpu.memory_space<vmem>>, vector<8x128xf32>
    %cst_22 = arith.constant dense<0.000000e+00> : vector<8x128xf32>
    %52 = tpu.matmul %45, %8, %cst_22 {dimension_numbers = #tpu.dot_dimension_numbers<[1], [0], [0], [1], [0, 0, 1, 1], [], []>} : vector<8x128xf32>, vector<128x128xf32>, vector<8x128xf32> -> vector<8x128xf32>
    %53 = arith.addf %51, %52 : vector<8x128xf32>
    %54 = math.tanh %53 : vector<8x128xf32>
    %55 = vector.shape_cast %47 : vector<8x1xi1> to vector<8x1xi1>
    %56 = vector.broadcast %55 : vector<8x1xi1> to vector<8x128xi1>
    %57 = arith.select %56, %54, %45 : vector<8x128xi1>, vector<8x128xf32>
    %c4_i32 = arith.constant 4 : i32
    %58 = vector.broadcast %c4_i32 : i32 to vector<8x1xi32>
    %59 = arith.cmpi slt, %58, %7 : vector<8x1xi32>
    %c8_i32_23 = arith.constant 8 : i32
    %60 = arith.muli %c4_i32, %c8_i32_23 : i32
    %61 = tpu.assume_multiple %60, 8 : i32
    %62 = arith.index_cast %61 : i32 to index
    %c0_24 = arith.constant 0 : index
    %63 = vector.load %arg8[%62, %c0_24] : memref<64x128xf32, #tpu.memory_space<vmem>>, vector<8x128xf32>
    %cst_25 = arith.constant dense<0.000000e+00> : vector<8x128xf32>
    %64 = tpu.matmul %57, %8, %cst_25 {dimension_numbers = #tpu.dot_dimension_numbers<[1], [0], [0], [1], [0, 0, 1, 1], [], []>} : vector<8x128xf32>, vector<128x128xf32>, vector<8x128xf32> -> vector<8x128xf32>
    %65 = arith.addf %63, %64 : vector<8x128xf32>
    %66 = math.tanh %65 : vector<8x128xf32>
    %67 = vector.shape_cast %59 : vector<8x1xi1> to vector<8x1xi1>
    %68 = vector.broadcast %67 : vector<8x1xi1> to vector<8x128xi1>
    %69 = arith.select %68, %66, %57 : vector<8x128xi1>, vector<8x128xf32>
    %c5_i32 = arith.constant 5 : i32
    %70 = vector.broadcast %c5_i32 : i32 to vector<8x1xi32>
    %71 = arith.cmpi slt, %70, %7 : vector<8x1xi32>
    %c8_i32_26 = arith.constant 8 : i32
    %72 = arith.muli %c5_i32, %c8_i32_26 : i32
    %73 = tpu.assume_multiple %72, 8 : i32
    %74 = arith.index_cast %73 : i32 to index
    %c0_27 = arith.constant 0 : index
    %75 = vector.load %arg8[%74, %c0_27] : memref<64x128xf32, #tpu.memory_space<vmem>>, vector<8x128xf32>
    %cst_28 = arith.constant dense<0.000000e+00> : vector<8x128xf32>
    %76 = tpu.matmul %69, %8, %cst_28 {dimension_numbers = #tpu.dot_dimension_numbers<[1], [0], [0], [1], [0, 0, 1, 1], [], []>} : vector<8x128xf32>, vector<128x128xf32>, vector<8x128xf32> -> vector<8x128xf32>
    %77 = arith.addf %75, %76 : vector<8x128xf32>
    %78 = math.tanh %77 : vector<8x128xf32>
    %79 = vector.shape_cast %71 : vector<8x1xi1> to vector<8x1xi1>
    %80 = vector.broadcast %79 : vector<8x1xi1> to vector<8x128xi1>
    %81 = arith.select %80, %78, %69 : vector<8x128xi1>, vector<8x128xf32>
    %c6_i32 = arith.constant 6 : i32
    %82 = vector.broadcast %c6_i32 : i32 to vector<8x1xi32>
    %83 = arith.cmpi slt, %82, %7 : vector<8x1xi32>
    %c8_i32_29 = arith.constant 8 : i32
    %84 = arith.muli %c6_i32, %c8_i32_29 : i32
    %85 = tpu.assume_multiple %84, 8 : i32
    %86 = arith.index_cast %85 : i32 to index
    %c0_30 = arith.constant 0 : index
    %87 = vector.load %arg8[%86, %c0_30] : memref<64x128xf32, #tpu.memory_space<vmem>>, vector<8x128xf32>
    %cst_31 = arith.constant dense<0.000000e+00> : vector<8x128xf32>
    %88 = tpu.matmul %81, %8, %cst_31 {dimension_numbers = #tpu.dot_dimension_numbers<[1], [0], [0], [1], [0, 0, 1, 1], [], []>} : vector<8x128xf32>, vector<128x128xf32>, vector<8x128xf32> -> vector<8x128xf32>
    %89 = arith.addf %87, %88 : vector<8x128xf32>
    %90 = math.tanh %89 : vector<8x128xf32>
    %91 = vector.shape_cast %83 : vector<8x1xi1> to vector<8x1xi1>
    %92 = vector.broadcast %91 : vector<8x1xi1> to vector<8x128xi1>
    %93 = arith.select %92, %90, %81 : vector<8x128xi1>, vector<8x128xf32>
    %c7_i32 = arith.constant 7 : i32
    %94 = vector.broadcast %c7_i32 : i32 to vector<8x1xi32>
    %95 = arith.cmpi slt, %94, %7 : vector<8x1xi32>
    %c8_i32_32 = arith.constant 8 : i32
    %96 = arith.muli %c7_i32, %c8_i32_32 : i32
    %97 = tpu.assume_multiple %96, 8 : i32
    %98 = arith.index_cast %97 : i32 to index
    %c0_33 = arith.constant 0 : index
    %99 = vector.load %arg8[%98, %c0_33] : memref<64x128xf32, #tpu.memory_space<vmem>>, vector<8x128xf32>
    %cst_34 = arith.constant dense<0.000000e+00> : vector<8x128xf32>
    %100 = tpu.matmul %93, %8, %cst_34 {dimension_numbers = #tpu.dot_dimension_numbers<[1], [0], [0], [1], [0, 0, 1, 1], [], []>} : vector<8x128xf32>, vector<128x128xf32>, vector<8x128xf32> -> vector<8x128xf32>
    %101 = arith.addf %99, %100 : vector<8x128xf32>
    %102 = math.tanh %101 : vector<8x128xf32>
    %103 = vector.shape_cast %95 : vector<8x1xi1> to vector<8x1xi1>
    %104 = vector.broadcast %103 : vector<8x1xi1> to vector<8x128xi1>
    %105 = arith.select %104, %102, %93 : vector<8x128xi1>, vector<8x128xf32>
    %c8_i32_35 = arith.constant 8 : i32
    %c0_36 = arith.constant 0 : index
    %c0_37 = arith.constant 0 : index
    %106 = vector.load %arg5[%c0_36, %c0_37] : memref<128x128xf32, #tpu.memory_space<vmem>>, vector<128x128xf32>
    %cst_38 = arith.constant dense<0.000000e+00> : vector<8x128xf32>
    %107 = tpu.matmul %105, %106, %cst_38 {dimension_numbers = #tpu.dot_dimension_numbers<[1], [0], [0], [1], [0, 0, 1, 1], [], []>} : vector<8x128xf32>, vector<128x128xf32>, vector<8x128xf32> -> vector<8x128xf32>
    %c0_39 = arith.constant 0 : index
    %c0_40 = arith.constant 0 : index
    %108 = vector.load %arg6[%c0_39, %c0_40] : memref<1x128xf32, #tpu.memory_space<vmem>>, vector<1x128xf32>
    %109 = vector.broadcast %108 : vector<1x128xf32> to vector<8x128xf32>
    %110 = arith.addf %107, %109 : vector<8x128xf32>
    %cst_41 = arith.constant dense<0xFF800000> : vector<8xf32>
    %111 = vector.multi_reduction <maximumf>, %110, %cst_41 [1] : vector<8x128xf32> to vector<8xf32>
    %112 = vector.shape_cast %111 : vector<8xf32> to vector<8x1xf32>
    %113 = vector.broadcast %112 : vector<8x1xf32> to vector<8x128xf32>
    %114 = arith.subf %110, %113 : vector<8x128xf32>
    %115 = math.exp %114 : vector<8x128xf32>
    %cst_42 = arith.constant dense<0.000000e+00> : vector<8xf32>
    %116 = vector.multi_reduction <add>, %115, %cst_42 [1] : vector<8x128xf32> to vector<8xf32>
    %117 = vector.shape_cast %116 : vector<8xf32> to vector<8x1xf32>
    %118 = math.log %117 : vector<8x1xf32>
    %119 = vector.broadcast %118 : vector<8x1xf32> to vector<8x128xf32>
    %120 = arith.subf %114, %119 : vector<8x128xf32>
    %c0_43 = arith.constant 0 : index
    %c0_44 = arith.constant 0 : index
    %121 = vector.load %arg7[%c0_43, %c0_44] : memref<8x128xf32, #tpu.memory_space<vmem>>, vector<8x128xf32>
    tpu.vector_store %arg7[%c0_43, %c0_44], %120 {strides = array<i32>} : memref<8x128xf32, #tpu.memory_space<vmem>>, vector<8x128xf32>,
    return
  }
}

</mosaic_0001>

<bundles_post_ra>
// kernel: tpu_custom_call.1
= control target key start
LH: loop header
LB: loop body
LE: loop exit
PB: predicated region body
PF: predicated region fallthrough
CT: control target
= control target key end

     0   :  { %12 = vsyncpa [#allocation4], 0  ;;  %s2070_s0 = inlined_call_operand.vmem [shape: f32[64,16], index: 0, kind: input, shape index: {}]   ;;  %s2071_s1 = inlined_call_operand.vmem [shape: s32[8,1], index: 1, kind: input, shape index: {}]   ;;  %s2072_s2 = inlined_call_operand.vmem [shape: f32[16,128], index: 2, kind: input, shape index: {}]   ;;  %s2073_s3 = inlined_call_operand.hbm [shape: f32[128,128], index: 3, kind: input, shape index: {}]   ;;  %s2074_s4 = inlined_call_operand.vmem [shape: f32[1,128], index: 4, kind: input, shape index: {}]   ;;  %s2075_s5 = inlined_call_operand.hbm [shape: f32[128,128], index: 5, kind: input, shape index: {}]   ;;  %s2076_s6 = inlined_call_operand.vmem [shape: f32[1,128], index: 6, kind: input, shape index: {}]   ;;  %s2077_s7 = inlined_call_operand.hbm [shape: f32[8,128], index: 7, kind: output, shape index: {}]  }
   0x1   :  { %13 = vsyncpa [#allocation7], 0 }
   0x2   :  { %14 = vsyncpa [#allocation5], 0  ;;  %s1595_s24 = smov [#allocation3]  }
   0x3   :  { %s26_s25 = sshll.u32 %s1595_s24, 4  ;;  %s27_s25 = int_to_ptr.vmem [resolvable:$true] %s26_s25 }
   0x4   :  { %s1537_s26 = scalar_lea.vmem %s27_s25, 2048  ;;  %p1542_p1 = scmp.lt.s32.totalorder %s27_s25, %s27_s25 }
   0x5   :  { %p1538_p0 = scmp.ne.s32.totalorder %s27_s25, %s1537_s26  ;;  %p1543_p2 = scmp.lt.s32.totalorder %s1537_s26, %s1537_s26 }
   0x7   :  { %p1544_p3 = por %p1543_p2, %p1542_p1 }
   0x9   :  { %p1545_p4 = pnand %p1544_p3, %p1538_p0 }
   0xb   :  { %1548 = shalt.err (!%p1545_p4)
}
   0xc   :  { %s1596_s27 = smov 128   ;;  %s1597_s28 = smov 8  }
   0xd   :  { %32 = dma.hbm_to_vmem [thread:$0]  %s2073_s3, 2048, %s27_s25, [#allocation4], %s1596_s27, %s1596_s27, %s1597_s28  }
   0xe   :  { %s1598_s8 = smov [#allocation6]  }
   0xf   :  { %s40_s9 = sshll.u32 %s1598_s8, 4  ;;  %s41_s9 = int_to_ptr.vmem [resolvable:$true] %s40_s9 }
  0x10   :  { %s1557_s10 = scalar_lea.vmem %s41_s9, 2048  ;;  %p1562_p6 = scmp.lt.s32.totalorder %s41_s9, %s41_s9 }
  0x11   :  { %p1558_p5 = scmp.ne.s32.totalorder %s41_s9, %s1557_s10  ;;  %p1563_p7 = scmp.lt.s32.totalorder %s1557_s10, %s1557_s10 }
  0x13   :  { %p1564_p8 = por %p1563_p7, %p1562_p6 }
  0x15   :  { %p1565_p9 = pnand %p1564_p8, %p1558_p5 }
  0x17   :  { %1568 = shalt.err (!%p1565_p9)
}
  0x18   :  { %46 = dma.hbm_to_vmem [thread:$0]  %s2075_s5, 2048, %s41_s9, [#allocation7], %s1596_s27, %s1596_s27, %s1597_s28  }
  0x19   :  { %1589 = dma.done.wait [#allocation4], 2048  }
  0x1a   :  { %1590 = vsyncadd [#allocation4], 4294965248 }
  0x1b   :  { %1591 = dma.done.wait [#allocation7], 2048  }
  0x1c   :  { %1592 = vsyncadd [#allocation7], 4294965248  ;;  %v1599_v0 = vmov 0.0   ;;  %vm1600_vm0 = vmmov 0   ;;  %v1601_v1 = vmov 0   ;;  %v1654_v2 = vld [vmem:[#allocation3 + $0x78] sm:$0xff] }
  0x1d   :  { %1184 = vmatprep.subr.mxu1 %v1599_v0  ;;  %1216 = vmatprep.mubr.msk.f32.mxu1 %vm1600_vm0, %v1599_v0  ;;  %v1656_v3 = vld [vmem:[#allocation3 + $0x70] sm:$0xff]  ;;  %v1660_v4 = vld [vmem:[#allocation3 + $0x68] sm:$0xff]  ;;  %v1667_v6 = vld [vmem:[#allocation3 + $0x60] sm:$0xff]  ;;  %vm72_vm1 = vcmask 130048   ;;  %s1602_s10 = smov [#allocation8]  }
  0x1e   :  { %1507 = vset.pattern.permute.xlu0 %v1601_v1  ;;  %1508 = vset.pattern.permute.xlu1 %v1601_v1  ;;  %v64_v5 = vld [vmem:[%s2072_s2 + $0x8] sm:$0xff]  ;;  %v63_v7 = vld [vmem:[%s2072_s2] sm:$0xff]  ;;  %v1677_v9 = vld [vmem:[#allocation3 + $0x58] sm:$0xff]  ;;  %s984_s11 = sshll.u32 %s1602_s10, 4  ;;  %s985_s11 = int_to_ptr.vmem [resolvable:$true] %s984_s11 }
  0x1f   :  { %1185 = vmatpush3.msra.mxu1 %v1654_v2  ;;  %1168 = vmatprep.subr.mxu0 %v64_v5  ;;  %v55_v8 = vld [vmem:[%s2070_s0] sm:$0xff]  ;;  %v56_v10 = vld [vmem:[%s2070_s0 + $0x8] sm:$0xff]  ;;  %v1690_v12 = vld [vmem:[#allocation3 + $0x50] sm:$0xff]  ;;  %p1574_p11 = scmp.lt.s32.totalorder %s985_s11, %s985_s11 }
  0x20   :  { %1186 = vmatprep.subr.mxu1 %v1599_v0  ;;  %1169 = vmatpush3.msra.mxu0 %v64_v5  ;;  %v1685_v11 = vld [vmem:[%s2071_s1] sm:$0xff]  ;;  %v1698_v14 = vld [vmem:[#allocation3 + $0x48] sm:$0xff]  ;;  %v1711_v17 = vld [vmem:[#allocation3 + $0x38] sm:$0xff] }
  0x21   :  { %1187 = vmatpush3.msra.mxu1 %v1656_v3  ;;  %1170 = vmatprep.subr.mxu0 %v63_v7  ;;  %vm227_vm2 = vcmp.gt.s32.totalorder %v1685_v11, 0  ;;  %vm307_vm3 = vcmp.gt.s32.totalorder %v1685_v11, 1  ;;  %v1704_v16 = vld [vmem:[#allocation3 + $0x40] sm:$0xff]  ;;  %vm550_vm4 = vcmp.gt.s32.totalorder %v1685_v11, 4  ;;  %v1717_v19 = vld [vmem:[#allocation3 + $0x30] sm:$0xff]  ;;  %vm712_vm5 = vcmp.gt.s32.totalorder %v1685_v11, 6 }
  0x22   :  { %1188 = vmatprep.subr.mxu1 %v1599_v0  ;;  %1171 = vmatpush3.msra.mxu0 %v63_v7  ;;  %v301_v13 = vsel %vm227_vm2, 1, %v1601_v1  ;;  %v382_v15 = vsel %vm307_vm3, 1, %v1601_v1  ;;  %v625_v18 = vsel %vm550_vm4, 1, %v1601_v1  ;;  %v1724_v20 = vld [vmem:[#allocation3 + $0x28] sm:$0xff]  ;;  %v787_v21 = vsel %vm712_vm5, 1, %v1601_v1  ;;  %v1730_v22 = vld [vmem:[#allocation3 + $0x20] sm:$0xff] }
  0x23   :  { %1189 = vmatpush3.msra.mxu1 %v1660_v4  ;;  %1172 = vmatprep.mubr.msk.f32.mxu0 %vm72_vm1, %v55_v8  ;;  %v1736_v23 = vld [vmem:[#allocation3 + $0x18] sm:$0xff]  ;;  %v1741_v24 = vld [vmem:[#allocation3 + $0x10] sm:$0xff]  ;;  %v1747_v25 = vld [vmem:[#allocation3 + $0x8] sm:$0xff]  ;;  %vm388_vm7 = vcmp.gt.s32.totalorder %v1685_v11, 2  ;;  %vm469_vm8 = vcmp.gt.s32.totalorder %v1685_v11, 3  ;;  %vm631_vm9 = vcmp.gt.s32.totalorder %v1685_v11, 5 }
  0x24   :  { %1190 = vmatprep.subr.mxu1 %v1599_v0  ;;  %1173 = vmatmul.mubr.msk.f32.vlgmr.msra.gmra.mxu0 %vm72_vm1, %v56_v10  ;;  %v1753_v26 = vld [vmem:[#allocation3] sm:$0xff]  ;;  %v57_v27 = vld [vmem:[%s2070_s0 + $0x10] sm:$0xff]  ;;  %v58_v28 = vld [vmem:[%s2070_s0 + $0x18] sm:$0xff]  ;;  %v463_v43 = vsel %vm388_vm7, 1, %v1601_v1  ;;  %v544_v44 = vsel %vm469_vm8, 1, %v1601_v1  ;;  %v706_v45 = vsel %vm631_vm9, 1, %v1601_v1 }
  0x25   :  { %1191 = vmatpush3.msra.mxu1 %v1667_v6  ;;  %303 = vperm.xlu0 %1507, %v301_v13   ;;  %v59_v29 = vld [vmem:[%s2070_s0 + $0x20] sm:$0xff]  ;;  %v60_v30 = vld [vmem:[%s2070_s0 + $0x28] sm:$0xff]  ;;  %v61_v31 = vld [vmem:[%s2070_s0 + $0x30] sm:$0xff]  ;;  %vm793_vm10 = vcmp.gt.s32.totalorder %v1685_v11, 7 }
  0x26   :  { %1192 = vmatprep.subr.mxu1 %v1599_v0  ;;  %1219 = vmatprep.subr.mxu0 %v1599_v0  ;;  %v62_v32 = vld [vmem:[%s2070_s0 + $0x38] sm:$0xff]  ;;  %v1844_v34 = vld [vmem:[%s2074_s4] ss:$0 sm:$0xff]  ;;  %v868_v46 = vsel %vm793_vm10, 1, %v1601_v1 }
  0x27   :  { %1193 = vmatpush3.msra.mxu1 %v1677_v9  ;;  %1220 = vmatpush3.msra.mxu0 %v1654_v2 }
  0x28   :  { %1194 = vmatprep.subr.mxu1 %v1599_v0  ;;  %1221 = vmatprep.subr.mxu0 %v1599_v0 }
  0x29   :  { %1195 = vmatpush3.msra.mxu1 %v1690_v12  ;;  %384 = vperm.xlu0 %1507, %v382_v15  }
  0x2a   :  { %1196 = vmatprep.subr.mxu1 %v1599_v0  ;;  %1222 = vmatpush3.msra.mxu0 %v1656_v3 }
  0x2b   :  { %1197 = vmatpush3.msra.mxu1 %v1698_v14  ;;  %1223 = vmatprep.subr.mxu0 %v1599_v0 }
  0x2c   :  { %1198 = vmatprep.subr.mxu1 %v1599_v0  ;;  %1224 = vmatpush3.msra.mxu0 %v1660_v4 }
  0x2d   :  { %1199 = vmatpush3.msra.mxu1 %v1704_v16  ;;  %627 = vperm.xlu0 %1507, %v625_v18  }
  0x2e   :  { %1200 = vmatprep.subr.mxu1 %v1599_v0  ;;  %1225 = vmatprep.subr.mxu0 %v1599_v0 }
  0x2f   :  { %1201 = vmatpush3.msra.mxu1 %v1711_v17  ;;  %1226 = vmatpush3.msra.mxu0 %v1667_v6 }
  0x30   :  { %1202 = vmatprep.subr.mxu1 %v1599_v0  ;;  %1227 = vmatprep.subr.mxu0 %v1599_v0 }
  0x31   :  { %1203 = vmatpush3.msra.mxu1 %v1717_v19  ;;  %789 = vperm.xlu0 %1507, %v787_v21  }
  0x32   :  { %1204 = vmatprep.subr.mxu1 %v1599_v0  ;;  %1228 = vmatpush3.msra.mxu0 %v1677_v9 }
  0x33   :  { %1205 = vmatpush3.msra.mxu1 %v1724_v20  ;;  %1229 = vmatprep.subr.mxu0 %v1599_v0 }
  0x34   :  { %1206 = vmatprep.subr.mxu1 %v1599_v0  ;;  %1230 = vmatpush3.msra.mxu0 %v1690_v12 }
  0x35   :  { %1207 = vmatpush3.msra.mxu1 %v1730_v22  ;;  %1231 = vmatprep.subr.mxu0 %v1599_v0 }
  0x36   :  { %1208 = vmatprep.subr.mxu1 %v1599_v0  ;;  %1232 = vmatpush3.msra.mxu0 %v1698_v14 }
  0x37   :  { %1209 = vmatpush3.msra.mxu1 %v1736_v23  ;;  %1233 = vmatprep.subr.mxu0 %v1599_v0 }
  0x38   :  { %1210 = vmatprep.subr.mxu1 %v1599_v0  ;;  %1234 = vmatpush3.msra.mxu0 %v1704_v16 }
  0x39   :  { %1211 = vmatpush3.msra.mxu1 %v1741_v24  ;;  %1235 = vmatprep.subr.mxu0 %v1599_v0 }
  0x3a   :  { %1212 = vmatprep.subr.mxu1 %v1599_v0  ;;  %1236 = vmatpush3.msra.mxu0 %v1711_v17 }
  0x3b   :  { %1213 = vmatpush3.msra.mxu1 %v1747_v25  ;;  %1237 = vmatprep.subr.mxu0 %v1599_v0 }
  0x3c   :  { %1214 = vmatprep.subr.mxu1 %v1599_v0  ;;  %1238 = vmatpush3.msra.mxu0 %v1717_v19 }
  0x3d   :  { %1215 = vmatpush3.msra.mxu1 %v1753_v26  ;;  %1239 = vmatprep.subr.mxu0 %v1599_v0 }
  0x3e   :  { %1217 = vmatmul.mubr.f32.vlgmr.msra.gmra.mxu1 %v1599_v0  ;;  %1254 = vmatprep.subr.mxu1 %v1599_v0 }
  0x3f   :  { %1255 = vmatpush3.msra.mxu1 %v1654_v2  ;;  %1240 = vmatpush3.msra.mxu0 %v1724_v20 }
  0x40   :  { %1256 = vmatprep.subr.mxu1 %v1599_v0  ;;  %1241 = vmatprep.subr.mxu0 %v1599_v0 }
  0x41   :  { %1257 = vmatpush3.msra.mxu1 %v1656_v3  ;;  %1242 = vmatpush3.msra.mxu0 %v1730_v22 }
  0x42   :  { %1258 = vmatprep.subr.mxu1 %v1599_v0  ;;  %1243 = vmatprep.subr.mxu0 %v1599_v0 }
  0x43   :  { %1259 = vmatpush3.msra.mxu1 %v1660_v4  ;;  %1244 = vmatpush3.msra.mxu0 %v1736_v23 }
  0x44   :  { %1260 = vmatprep.subr.mxu1 %v1599_v0  ;;  %1245 = vmatprep.subr.mxu0 %v1599_v0 }
  0x45   :  { %1261 = vmatpush3.msra.mxu1 %v1667_v6  ;;  %1246 = vmatpush3.msra.mxu0 %v1741_v24 }
  0x46   :  { %1262 = vmatprep.subr.mxu1 %v1599_v0  ;;  %1247 = vmatprep.subr.mxu0 %v1599_v0 }
  0x47   :  { %1263 = vmatpush3.msra.mxu1 %v1677_v9  ;;  %1248 = vmatpush3.msra.mxu0 %v1747_v25 }
  0x48   :  { %1264 = vmatprep.subr.mxu1 %v1599_v0  ;;  %1249 = vmatprep.subr.mxu0 %v1599_v0 }
  0x49   :  { %1265 = vmatpush3.msra.mxu1 %v1690_v12  ;;  %1250 = vmatpush3.msra.mxu0 %v1753_v26 }
  0x4a   :  { %1266 = vmatprep.subr.mxu1 %v1599_v0  ;;  %1286 = vmatprep.mubr.msk.f32.mxu1 %vm1600_vm0, %v1599_v0 }
  0x4b   :  { %1267 = vmatpush3.msra.mxu1 %v1698_v14  ;;  %1289 = vmatprep.subr.mxu0 %v1599_v0 }
  0x4c   :  { %1268 = vmatprep.subr.mxu1 %v1599_v0  ;;  %1175 = vmatprep.mubr.msk.f32.mxu0 %vm72_vm1, %v57_v27 }
  0x4d   :  { %1269 = vmatpush3.msra.mxu1 %v1704_v16  ;;  %1176 = vmatmul.mubr.msk.f32.gmra.mxu0 %vm72_vm1, %v58_v28 }
  0x4e   :  { %1270 = vmatprep.subr.mxu1 %v1599_v0  ;;  %1178 = vmatprep.mubr.msk.f32.mxu0 %vm72_vm1, %v59_v29 }
  0x4f   :  { %1271 = vmatpush3.msra.mxu1 %v1711_v17  ;;  %465 = vperm.xlu1 %1508, %v463_v43   ;;  %v879_v43 = vld [vmem:[#allocation6 + $0x28] sm:$0xff] }
  0x50   :  { %1272 = vmatprep.subr.mxu1 %v1599_v0 }
  0x51   :  { %1273 = vmatpush3.msra.mxu1 %v1717_v19  ;;  %1179 = vmatmul.mubr.msk.f32.gmra.mxu0 %vm72_vm1, %v60_v30 }
  0x52   :  { %1274 = vmatprep.subr.mxu1 %v1599_v0  ;;  %1181 = vmatprep.mubr.msk.f32.mxu0 %vm72_vm1, %v61_v31 }
  0x53   :  { %1275 = vmatpush3.msra.mxu1 %v1724_v20  ;;  %546 = vperm.xlu1 %1508, %v544_v44   ;;  %v878_v44 = vld [vmem:[#allocation6 + $0x20] sm:$0xff] }
  0x54   :  { %1276 = vmatprep.subr.mxu1 %v1599_v0 }
  0x55   :  { %1277 = vmatpush3.msra.mxu1 %v1730_v22  ;;  %1182 = vmatmul.mubr.msk.f32.gmra.mxu0 %vm72_vm1, %v62_v32 }
  0x56   :  { %1278 = vmatprep.subr.mxu1 %v1599_v0  ;;  %1251 = vmatprep.mubr.msk.f32.mxu0 %vm1600_vm0, %v1599_v0 }
  0x57   :  { %1279 = vmatpush3.msra.mxu1 %v1736_v23  ;;  %708 = vperm.xlu1 %1508, %v706_v45   ;;  %v877_v45 = vld [vmem:[#allocation6 + $0x18] sm:$0xff] }
  0x58   :  { %1280 = vmatprep.subr.mxu1 %v1599_v0 }
  0x59   :  { %1281 = vmatpush3.msra.mxu1 %v1741_v24 }
  0x5a   :  { %1282 = vmatprep.subr.mxu1 %v1599_v0 }
  0x5b   :  { %1283 = vmatpush3.msra.mxu1 %v1747_v25  ;;  %870 = vperm.xlu1 %1508, %v868_v46   ;;  %v876_v46 = vld [vmem:[#allocation6 + $0x10] sm:$0xff] }
  0x5c   :  { %1284 = vmatprep.subr.mxu1 %v1599_v0 }
  0x5d   :  { %1285 = vmatpush3.msra.mxu1 %v1753_v26 }
  0x5e   :  { %1324 = vmatprep.subr.mxu1 %v1599_v0 }
  0xa0   :  { %v304_v40 = vpop.permute.xlu0 %303 }
  0xa1   :  { %vm305_vm6 = vcmp.eq.s32.totalorder %v304_v40, 1  ;;  %v882_v40 = vld [vmem:[#allocation6 + $0x40] sm:$0xff] }
  0xa4   :  { %v385_v57 = vpop.permute.xlu0 %384 }
  0xa5   :  { %vm386_vm11 = vcmp.eq.s32.totalorder %v385_v57, 1  ;;  %v1004_v57 = vld [vmem:[%s2076_s6] ss:$0 sm:$0xff]  ;;  %s1569_s6 = scalar_lea.vmem %s985_s11, 128 }
  0xa6   :  { %p1570_p10 = scmp.ne.s32.totalorder %s985_s11, %s1569_s6  ;;  %p1575_p12 = scmp.lt.s32.totalorder %s1569_s6, %s1569_s6 }
  0xa8   :  { %v628_v31 = vpop.permute.xlu0 %627  ;;  %p1576_p13 = por %p1575_p12, %p1574_p11 }
  0xa9   :  { %vm629_vm14 = vcmp.eq.s32.totalorder %v628_v31, 1 }
  0xaa   :  { %p1577_p0 = pnand %p1576_p13, %p1570_p10 }
  0xca   :  { %v466_v1 = vpop.permute.xlu1 %465 }
  0xcb   :  { %vm467_vm12 = vcmp.eq.s32.totalorder %v466_v1, 1 }
  0xce   :  { %v547_v15 = vpop.permute.xlu1 %546 }
  0xcf   :  { %vm548_vm13 = vcmp.eq.s32.totalorder %v547_v15, 1 }
  0xe4   :  { %v1839_v33 = vpop.f32.mrf.mxu0 }
  0xe5   :  { %v169_v53 = vadd.f32 %v1839_v33, %v1844_v34 }
  0xe6   :  { %v163_v35 = vpop.f32.mrf.mxu0 }
  0xe7   :  { %v164_v36 = vadd.f32 %v1844_v34, %v163_v35 }
  0xfe   :  { %v295_v37 = vpop.f32.mrf.mxu1 }
  0xff   :  { %v299_v38 = vadd.f32 %v295_v37, %v164_v36  ;;  %v790_v37 = vpop.permute.xlu0 %789 }
 0x100   :  { %v1218_v39 = vpop.f32.mrf.mxu1 }
 0x101   :  { %1509 = vtanh.f32 %v299_v38 }
 0x10d   :  { %v1889_v47 = vpop.f32.mrf.mxu0 }
 0x10e   :  { %v1510_v41 = vpop.eup %1509  ;;  %v179_v8 = vadd.f32 %v1889_v47, %v1844_v34  ;;  %v875_v47 = vld [vmem:[#allocation6 + $0x8] sm:$0xff] }
 0x10f   :  { %v306_v42 = vsel %vm305_vm6, %v1510_v41, 0.0  ;;  %1252 = vmatmul.mubr.msk.f32.vlgmr.msra.gmra.mxu0 %vm305_vm6, %v1510_v41  ;;  %v173_v48 = vpop.f32.mrf.mxu0  ;;  %v881_v41 = vld [vmem:[#allocation6 + $0x38] sm:$0xff] }
 0x110   :  { %1290 = vmatpush3.msra.mxu0 %v1654_v2  ;;  %1321 = vmatprep.mubr.msk.f32.mxu0 %vm1600_vm0, %v1599_v0  ;;  %v174_v60 = vadd.f32 %v1844_v34, %v173_v48  ;;  %v874_v48 = vld [vmem:[#allocation6] sm:$0xff] }
 0x111   :  { %1291 = vmatprep.subr.mxu0 %v1599_v0  ;;  %v1891_v49 = vpop.f32.mrf.mxu0 }
 0x112   :  { %1292 = vmatpush3.msra.mxu0 %v1656_v3 }
 0x113   :  { %1293 = vmatprep.subr.mxu0 %v1599_v0  ;;  %v1893_v50 = vpop.f32.mrf.mxu0 }
 0x114   :  { %1294 = vmatpush3.msra.mxu0 %v1660_v4  ;;  %v184_v27 = vadd.f32 %v1844_v34, %v1893_v50 }
 0x115   :  { %1295 = vmatprep.subr.mxu0 %v1599_v0  ;;  %v1895_v51 = vpop.f32.mrf.mxu0 }
 0x116   :  { %1296 = vmatpush3.msra.mxu0 %v1667_v6 }
 0x117   :  { %1297 = vmatprep.subr.mxu0 %v1599_v0  ;;  %v1897_v52 = vpop.f32.mrf.mxu0 }
 0x118   :  { %1298 = vmatpush3.msra.mxu0 %v1677_v9 }
 0x119   :  { %1299 = vmatprep.subr.mxu0 %v1599_v0 }
 0x11a   :  { %1300 = vmatpush3.msra.mxu0 %v1690_v12 }
 0x11b   :  { %1301 = vmatprep.subr.mxu0 %v1599_v0 }
 0x11c   :  { %1302 = vmatpush3.msra.mxu0 %v1698_v14 }
 0x11d   :  { %1303 = vmatprep.subr.mxu0 %v1599_v0 }
 0x11e   :  { %1304 = vmatpush3.msra.mxu0 %v1704_v16 }
 0x11f   :  { %1305 = vmatprep.subr.mxu0 %v1599_v0 }
 0x120   :  { %1306 = vmatpush3.msra.mxu0 %v1711_v17 }
 0x121   :  { %1307 = vmatprep.subr.mxu0 %v1599_v0 }
 0x122   :  { %1308 = vmatpush3.msra.mxu0 %v1717_v19 }
 0x123   :  { %1309 = vmatprep.subr.mxu0 %v1599_v0 }
 0x124   :  { %1310 = vmatpush3.msra.mxu0 %v1724_v20 }
 0x125   :  { %1311 = vmatprep.subr.mxu0 %v1599_v0 }
 0x126   :  { %1312 = vmatpush3.msra.mxu0 %v1730_v22 }
 0x127   :  { %1313 = vmatprep.subr.mxu0 %v1599_v0 }
 0x128   :  { %1314 = vmatpush3.msra.mxu0 %v1736_v23 }
 0x129   :  { %1315 = vmatprep.subr.mxu0 %v1599_v0 }
 0x12a   :  { %1316 = vmatpush3.msra.mxu0 %v1741_v24 }
 0x12b   :  { %1317 = vmatprep.subr.mxu0 %v1599_v0 }
 0x12c   :  { %1318 = vmatpush3.msra.mxu0 %v1747_v25 }
 0x12d   :  { %1319 = vmatprep.subr.mxu0 %v1599_v0 }
 0x12e   :  { %1320 = vmatpush3.msra.mxu0 %v1753_v26 }
 0x12f   :  { %1359 = vmatprep.subr.mxu0 %v1599_v0 }
 0x1cf   :  { %v376_v54 = vpop.f32.mrf.mxu0 }
 0x1d0   :  { %v380_v55 = vadd.f32 %v376_v54, %v169_v53 }
 0x1d1   :  { %v1253_v56 = vpop.f32.mrf.mxu0 }
 0x1d2   :  { %1511 = vtanh.f32 %v380_v55 }
 0x1df   :  { %v1512_v58 = vpop.eup %1511 }
 0x1e0   :  { %v387_v59 = vsel %vm386_vm11, %v1512_v58, %v306_v42  ;;  %v880_v42 = vld [vmem:[#allocation6 + $0x30] sm:$0xff] }
 0x1e1   :  { %1287 = vmatmul.mubr.f32.vlgmr.msra.gmra.mxu1 %v387_v59 }
 0x1e2   :  { %1325 = vmatpush3.msra.mxu1 %v1654_v2  ;;  %1356 = vmatprep.mubr.msk.f32.mxu1 %vm1600_vm0, %v1599_v0 }
 0x1e3   :  { %1326 = vmatprep.subr.mxu1 %v1599_v0 }
 0x1e4   :  { %1327 = vmatpush3.msra.mxu1 %v1656_v3 }
 0x1e5   :  { %1328 = vmatprep.subr.mxu1 %v1599_v0 }
 0x1e6   :  { %1329 = vmatpush3.msra.mxu1 %v1660_v4 }
 0x1e7   :  { %1330 = vmatprep.subr.mxu1 %v1599_v0 }
 0x1e8   :  { %1331 = vmatpush3.msra.mxu1 %v1667_v6 }
 0x1e9   :  { %1332 = vmatprep.subr.mxu1 %v1599_v0 }
 0x1ea   :  { %1333 = vmatpush3.msra.mxu1 %v1677_v9 }
 0x1eb   :  { %1334 = vmatprep.subr.mxu1 %v1599_v0 }
 0x1ec   :  { %1335 = vmatpush3.msra.mxu1 %v1690_v12 }
 0x1ed   :  { %1336 = vmatprep.subr.mxu1 %v1599_v0 }
 0x1ee   :  { %1337 = vmatpush3.msra.mxu1 %v1698_v14 }
 0x1ef   :  { %1338 = vmatprep.subr.mxu1 %v1599_v0 }
 0x1f0   :  { %1339 = vmatpush3.msra.mxu1 %v1704_v16 }
 0x1f1   :  { %1340 = vmatprep.subr.mxu1 %v1599_v0 }
 0x1f2   :  { %1341 = vmatpush3.msra.mxu1 %v1711_v17 }
 0x1f3   :  { %1342 = vmatprep.subr.mxu1 %v1599_v0 }
 0x1f4   :  { %1343 = vmatpush3.msra.mxu1 %v1717_v19 }
 0x1f5   :  { %1344 = vmatprep.subr.mxu1 %v1599_v0 }
 0x1f6   :  { %1345 = vmatpush3.msra.mxu1 %v1724_v20 }
 0x1f7   :  { %1346 = vmatprep.subr.mxu1 %v1599_v0 }
 0x1f8   :  { %1347 = vmatpush3.msra.mxu1 %v1730_v22 }
 0x1f9   :  { %1348 = vmatprep.subr.mxu1 %v1599_v0 }
 0x1fa   :  { %1349 = vmatpush3.msra.mxu1 %v1736_v23 }
 0x1fb   :  { %1350 = vmatprep.subr.mxu1 %v1599_v0 }
 0x1fc   :  { %1351 = vmatpush3.msra.mxu1 %v1741_v24 }
 0x1fd   :  { %1352 = vmatprep.subr.mxu1 %v1599_v0 }
 0x1fe   :  { %1353 = vmatpush3.msra.mxu1 %v1747_v25 }
 0x1ff   :  { %1354 = vmatprep.subr.mxu1 %v1599_v0 }
 0x200   :  { %1355 = vmatpush3.msra.mxu1 %v1753_v26 }
 0x201   :  { %1394 = vmatprep.subr.mxu1 %v1599_v0 }
 0x2a1   :  { %v457_v61 = vpop.f32.mrf.mxu1 }
 0x2a2   :  { %v461_v62 = vadd.f32 %v457_v61, %v174_v60 }
 0x2a3   :  { %v1288_v63 = vpop.f32.mrf.mxu1 }
 0x2a4   :  { %1513 = vtanh.f32 %v461_v62 }
 0x2b1   :  { %v1514_v5 = vpop.eup %1513 }
 0x2b2   :  { %v468_v7 = vsel %vm467_vm12, %v1514_v5, %v387_v59 }
 0x2b3   :  { %1322 = vmatmul.mubr.f32.vlgmr.msra.gmra.mxu0 %v468_v7 }
 0x2b4   :  { %1360 = vmatpush3.msra.mxu0 %v1654_v2  ;;  %1391 = vmatprep.mubr.msk.f32.mxu0 %vm1600_vm0, %v1599_v0 }
 0x2b5   :  { %1361 = vmatprep.subr.mxu0 %v1599_v0 }
 0x2b6   :  { %1362 = vmatpush3.msra.mxu0 %v1656_v3 }
 0x2b7   :  { %1363 = vmatprep.subr.mxu0 %v1599_v0 }
 0x2b8   :  { %1364 = vmatpush3.msra.mxu0 %v1660_v4 }
 0x2b9   :  { %1365 = vmatprep.subr.mxu0 %v1599_v0 }
 0x2ba   :  { %1366 = vmatpush3.msra.mxu0 %v1667_v6 }
 0x2bb   :  { %1367 = vmatprep.subr.mxu0 %v1599_v0 }
 0x2bc   :  { %1368 = vmatpush3.msra.mxu0 %v1677_v9 }
 0x2bd   :  { %1369 = vmatprep.subr.mxu0 %v1599_v0 }
 0x2be   :  { %1370 = vmatpush3.msra.mxu0 %v1690_v12 }
 0x2bf   :  { %1371 = vmatprep.subr.mxu0 %v1599_v0 }
 0x2c0   :  { %1372 = vmatpush3.msra.mxu0 %v1698_v14 }
 0x2c1   :  { %1373 = vmatprep.subr.mxu0 %v1599_v0 }
 0x2c2   :  { %1374 = vmatpush3.msra.mxu0 %v1704_v16 }
 0x2c3   :  { %1375 = vmatprep.subr.mxu0 %v1599_v0 }
 0x2c4   :  { %1376 = vmatpush3.msra.mxu0 %v1711_v17 }
 0x2c5   :  { %1377 = vmatprep.subr.mxu0 %v1599_v0 }
 0x2c6   :  { %1378 = vmatpush3.msra.mxu0 %v1717_v19 }
 0x2c7   :  { %1379 = vmatprep.subr.mxu0 %v1599_v0 }
 0x2c8   :  { %1380 = vmatpush3.msra.mxu0 %v1724_v20 }
 0x2c9   :  { %1381 = vmatprep.subr.mxu0 %v1599_v0 }
 0x2ca   :  { %1382 = vmatpush3.msra.mxu0 %v1730_v22 }
 0x2cb   :  { %1383 = vmatprep.subr.mxu0 %v1599_v0 }
 0x2cc   :  { %1384 = vmatpush3.msra.mxu0 %v1736_v23 }
 0x2cd   :  { %1385 = vmatprep.subr.mxu0 %v1599_v0 }
 0x2ce   :  { %1386 = vmatpush3.msra.mxu0 %v1741_v24 }
 0x2cf   :  { %1387 = vmatprep.subr.mxu0 %v1599_v0 }
 0x2d0   :  { %1388 = vmatpush3.msra.mxu0 %v1747_v25 }
 0x2d1   :  { %1389 = vmatprep.subr.mxu0 %v1599_v0 }
 0x2d2   :  { %1390 = vmatpush3.msra.mxu0 %v1753_v26 }
 0x2d3   :  { %1429 = vmatprep.subr.mxu0 %v1599_v0 }
 0x373   :  { %v538_v10 = vpop.f32.mrf.mxu0 }
 0x374   :  { %v542_v11 = vadd.f32 %v538_v10, %v179_v8 }
 0x375   :  { %v1323_v13 = vpop.f32.mrf.mxu0 }
 0x376   :  { %1515 = vtanh.f32 %v542_v11 }
 0x383   :  { %v1516_v18 = vpop.eup %1515 }
 0x384   :  { %v549_v21 = vsel %vm548_vm13, %v1516_v18, %v468_v7 }
 0x385   :  { %1357 = vmatmul.mubr.f32.vlgmr.msra.gmra.mxu1 %v549_v21 }
 0x386   :  { %1395 = vmatpush3.msra.mxu1 %v1654_v2  ;;  %1426 = vmatprep.mubr.msk.f32.mxu1 %vm1600_vm0, %v1599_v0 }
 0x387   :  { %1396 = vmatprep.subr.mxu1 %v1599_v0 }
 0x388   :  { %1397 = vmatpush3.msra.mxu1 %v1656_v3 }
 0x389   :  { %1398 = vmatprep.subr.mxu1 %v1599_v0 }
 0x38a   :  { %1399 = vmatpush3.msra.mxu1 %v1660_v4 }
 0x38b   :  { %1400 = vmatprep.subr.mxu1 %v1599_v0 }
 0x38c   :  { %1401 = vmatpush3.msra.mxu1 %v1667_v6 }
 0x38d   :  { %1402 = vmatprep.subr.mxu1 %v1599_v0 }
 0x38e   :  { %1403 = vmatpush3.msra.mxu1 %v1677_v9 }
 0x38f   :  { %1404 = vmatprep.subr.mxu1 %v1599_v0 }
 0x390   :  { %1405 = vmatpush3.msra.mxu1 %v1690_v12 }
 0x391   :  { %1406 = vmatprep.subr.mxu1 %v1599_v0 }
 0x392   :  { %1407 = vmatpush3.msra.mxu1 %v1698_v14 }
 0x393   :  { %1408 = vmatprep.subr.mxu1 %v1599_v0 }
 0x394   :  { %1409 = vmatpush3.msra.mxu1 %v1704_v16 }
 0x395   :  { %1410 = vmatprep.subr.mxu1 %v1599_v0 }
 0x396   :  { %1411 = vmatpush3.msra.mxu1 %v1711_v17 }
 0x397   :  { %1412 = vmatprep.subr.mxu1 %v1599_v0 }
 0x398   :  { %1413 = vmatpush3.msra.mxu1 %v1717_v19 }
 0x399   :  { %1414 = vmatprep.subr.mxu1 %v1599_v0 }
 0x39a   :  { %1415 = vmatpush3.msra.mxu1 %v1724_v20 }
 0x39b   :  { %1416 = vmatprep.subr.mxu1 %v1599_v0 }
 0x39c   :  { %1417 = vmatpush3.msra.mxu1 %v1730_v22 }
 0x39d   :  { %1418 = vmatprep.subr.mxu1 %v1599_v0 }
 0x39e   :  { %1419 = vmatpush3.msra.mxu1 %v1736_v23 }
 0x39f   :  { %1420 = vmatprep.subr.mxu1 %v1599_v0 }
 0x3a0   :  { %1421 = vmatpush3.msra.mxu1 %v1741_v24 }
 0x3a1   :  { %1422 = vmatprep.subr.mxu1 %v1599_v0 }
 0x3a2   :  { %1423 = vmatpush3.msra.mxu1 %v1747_v25 }
 0x3a3   :  { %1424 = vmatprep.subr.mxu1 %v1599_v0 }
 0x3a4   :  { %1425 = vmatpush3.msra.mxu1 %v1753_v26 }
 0x3a5   :  { %1464 = vmatprep.subr.mxu1 %v1599_v0 }
 0x445   :  { %v619_v28 = vpop.f32.mrf.mxu1 }
 0x446   :  { %v623_v29 = vadd.f32 %v619_v28, %v184_v27 }
 0x447   :  { %v1358_v30 = vpop.f32.mrf.mxu1 }
 0x448   :  { %1517 = vtanh.f32 %v623_v29 }
 0x455   :  { %v1518_v32 = vpop.eup %1517 }
 0x456   :  { %v630_v33 = vsel %vm629_vm14, %v1518_v32, %v549_v21 }
 0x457   :  { %1392 = vmatmul.mubr.f32.vlgmr.msra.gmra.mxu0 %v630_v33 }
 0x458   :  { %1430 = vmatpush3.msra.mxu0 %v1654_v2  ;;  %1461 = vmatprep.mubr.msk.f32.mxu0 %vm1600_vm0, %v1599_v0  ;;  %v189_v2 = vadd.f32 %v1891_v49, %v1844_v34  ;;  %v199_v49 = vadd.f32 %v1895_v51, %v1844_v34 }
 0x459   :  { %1431 = vmatprep.subr.mxu0 %v1599_v0 }
 0x45a   :  { %1432 = vmatpush3.msra.mxu0 %v1656_v3 }
 0x45b   :  { %1433 = vmatprep.subr.mxu0 %v1599_v0 }
 0x45c   :  { %1434 = vmatpush3.msra.mxu0 %v1660_v4 }
 0x45d   :  { %1435 = vmatprep.subr.mxu0 %v1599_v0 }
 0x45e   :  { %1436 = vmatpush3.msra.mxu0 %v1667_v6 }
 0x45f   :  { %1437 = vmatprep.subr.mxu0 %v1599_v0 }
 0x460   :  { %1438 = vmatpush3.msra.mxu0 %v1677_v9  ;;  %v709_v9 = vpop.permute.xlu1 %708 }
 0x461   :  { %1439 = vmatprep.subr.mxu0 %v1599_v0  ;;  %vm710_vm15 = vcmp.eq.s32.totalorder %v709_v9, 1 }
 0x462   :  { %1440 = vmatpush3.msra.mxu0 %v1690_v12 }
 0x463   :  { %1441 = vmatprep.subr.mxu0 %v1599_v0 }
 0x464   :  { %1442 = vmatpush3.msra.mxu0 %v1698_v14  ;;  %v871_v54 = vpop.permute.xlu1 %870 }
 0x465   :  { %1443 = vmatprep.subr.mxu0 %v1599_v0  ;;  %vm872_vm1 = vcmp.eq.s32.totalorder %v871_v54, 1 }
 0x466   :  { %1444 = vmatpush3.msra.mxu0 %v1704_v16  ;;  %v889_v16 = vld [vmem:[#allocation6 + $0x78] sm:$0xff] }
 0x467   :  { %1445 = vmatprep.subr.mxu0 %v1599_v0 }
 0x468   :  { %1446 = vmatpush3.msra.mxu0 %v1711_v17  ;;  %v888_v17 = vld [vmem:[#allocation6 + $0x70] sm:$0xff] }
 0x469   :  { %1447 = vmatprep.subr.mxu0 %v1599_v0 }
 0x46a   :  { %1448 = vmatpush3.msra.mxu0 %v1717_v19  ;;  %v887_v19 = vld [vmem:[#allocation6 + $0x68] sm:$0xff] }
 0x46b   :  { %1449 = vmatprep.subr.mxu0 %v1599_v0 }
 0x46c   :  { %1450 = vmatpush3.msra.mxu0 %v1724_v20  ;;  %v886_v20 = vld [vmem:[#allocation6 + $0x60] sm:$0xff] }
 0x46d   :  { %1451 = vmatprep.subr.mxu0 %v1599_v0 }
 0x46e   :  { %1452 = vmatpush3.msra.mxu0 %v1730_v22  ;;  %v885_v22 = vld [vmem:[#allocation6 + $0x58] sm:$0xff] }
 0x46f   :  { %1453 = vmatprep.subr.mxu0 %v1599_v0 }
 0x470   :  { %1454 = vmatpush3.msra.mxu0 %v1736_v23  ;;  %v884_v23 = vld [vmem:[#allocation6 + $0x50] sm:$0xff] }
 0x471   :  { %1455 = vmatprep.subr.mxu0 %v1599_v0 }
 0x472   :  { %1456 = vmatpush3.msra.mxu0 %v1741_v24  ;;  %v883_v24 = vld [vmem:[#allocation6 + $0x48] sm:$0xff] }
 0x473   :  { %1457 = vmatprep.subr.mxu0 %v1599_v0 }
 0x474   :  { %1458 = vmatpush3.msra.mxu0 %v1747_v25  ;;  %v194_v25 = vadd.f32 %v1844_v34, %v1897_v52 }
 0x475   :  { %1459 = vmatprep.subr.mxu0 %v1599_v0 }
 0x476   :  { %1460 = vmatpush3.msra.mxu0 %v1753_v26 }
 0x517   :  { %v700_v3 = vpop.f32.mrf.mxu0 }
 0x518   :  { %v704_v4 = vadd.f32 %v700_v3, %v189_v2 }
 0x519   :  { %v1393_v6 = vpop.f32.mrf.mxu0 }
 0x51a   :  { %1519 = vtanh.f32 %v704_v4 }
 0x527   :  { %v1520_v12 = vpop.eup %1519 }
 0x528   :  { %v711_v14 = vsel %vm710_vm15, %v1520_v12, %v630_v33 }
 0x529   :  { %1427 = vmatmul.mubr.f32.vlgmr.msra.gmra.mxu1 %v711_v14 }
 0x52a   :  { %1496 = vmatprep.mubr.msk.f32.mxu1 %vm1600_vm0, %v1599_v0  ;;  %1465 = vmatpush3.msra.mxu1 %v889_v16  ;;  %vm791_vm0 = vcmp.eq.s32.totalorder %v790_v37, 1 }
 0x52b   :  { %1466 = vmatprep.subr.mxu1 %v1599_v0 }
 0x52c   :  { %1467 = vmatpush3.msra.mxu1 %v888_v17 }
 0x52d   :  { %1468 = vmatprep.subr.mxu1 %v1599_v0 }
 0x52e   :  { %1469 = vmatpush3.msra.mxu1 %v887_v19 }
 0x52f   :  { %1470 = vmatprep.subr.mxu1 %v1599_v0 }
 0x530   :  { %1471 = vmatpush3.msra.mxu1 %v886_v20 }
 0x531   :  { %1472 = vmatprep.subr.mxu1 %v1599_v0 }
 0x532   :  { %1473 = vmatpush3.msra.mxu1 %v885_v22 }
 0x533   :  { %1474 = vmatprep.subr.mxu1 %v1599_v0 }
 0x534   :  { %1475 = vmatpush3.msra.mxu1 %v884_v23 }
 0x535   :  { %1476 = vmatprep.subr.mxu1 %v1599_v0 }
 0x536   :  { %1477 = vmatpush3.msra.mxu1 %v883_v24 }
 0x537   :  { %1478 = vmatprep.subr.mxu1 %v1599_v0 }
 0x538   :  { %1479 = vmatpush3.msra.mxu1 %v882_v40 }
 0x539   :  { %1480 = vmatprep.subr.mxu1 %v1599_v0 }
 0x53a   :  { %1481 = vmatpush3.msra.mxu1 %v881_v41 }
 0x53b   :  { %1482 = vmatprep.subr.mxu1 %v1599_v0 }
 0x53c   :  { %1483 = vmatpush3.msra.mxu1 %v880_v42 }
 0x53d   :  { %1484 = vmatprep.subr.mxu1 %v1599_v0 }
 0x53e   :  { %1485 = vmatpush3.msra.mxu1 %v879_v43 }
 0x53f   :  { %1486 = vmatprep.subr.mxu1 %v1599_v0 }
 0x540   :  { %1487 = vmatpush3.msra.mxu1 %v878_v44 }
 0x541   :  { %1488 = vmatprep.subr.mxu1 %v1599_v0 }
 0x542   :  { %1489 = vmatpush3.msra.mxu1 %v877_v45 }
 0x543   :  { %1490 = vmatprep.subr.mxu1 %v1599_v0 }
 0x544   :  { %1491 = vmatpush3.msra.mxu1 %v876_v46 }
 0x545   :  { %1492 = vmatprep.subr.mxu1 %v1599_v0 }
 0x546   :  { %1493 = vmatpush3.msra.mxu1 %v875_v47 }
 0x547   :  { %1494 = vmatprep.subr.mxu1 %v1599_v0 }
 0x548   :  { %1495 = vmatpush3.msra.mxu1 %v874_v48 }
 0x5e9   :  { %v781_v26 = vpop.f32.mrf.mxu1 }
 0x5ea   :  { %v785_v35 = vadd.f32 %v781_v26, %v194_v25 }
 0x5eb   :  { %v1428_v36 = vpop.f32.mrf.mxu1 }
 0x5ec   :  { %1521 = vtanh.f32 %v785_v35 }
 0x5f9   :  { %v1522_v38 = vpop.eup %1521 }
 0x5fa   :  { %v792_v39 = vsel %vm791_vm0, %v1522_v38, %v711_v14 }
 0x5fb   :  { %1462 = vmatmul.mubr.f32.vlgmr.msra.gmra.mxu0 %v792_v39 }
 0x6bb   :  { %v862_v50 = vpop.f32.mrf.mxu0 }
 0x6bc   :  { %v866_v52 = vadd.f32 %v862_v50, %v199_v49 }
 0x6bd   :  { %v1463_v53 = vpop.f32.mrf.mxu0 }
 0x6be   :  { %1523 = vtanh.f32 %v866_v52 }
 0x6cb   :  { %v1524_v55 = vpop.eup %1523 }
 0x6cc   :  { %v873_v56 = vsel %vm872_vm1, %v1524_v55, %v792_v39 }
 0x6cd   :  { %1497 = vmatmul.mubr.f32.vlgmr.msra.gmra.mxu1 %v873_v56 }
 0x78d   :  { %v963_v58 = vpop.f32.mrf.mxu1 }
 0x78e   :  { %v964_v59 = vadd.f32 %v1004_v57, %v963_v58 }
 0x78f   :  { %v1498_v0 = vpop.f32.mrf.mxu1 }
 0x790   :  { %967 = vmax.xlane.f32.xlu0 %v964_v59 }
 0x819   :  { %v968_v60 = vpop.xlane.xlu0 %967 }
 0x81a   :  { %v969_v61 = vsub.f32 %v964_v59, %v968_v60 }
 0x81c   :  { %v970_v34 = vmul.f32 1.442695, %v969_v61 }
 0x81e   :  { %1525 = vpow2.f32 %v970_v34 }
 0x82b   :  { %v1526_v51 = vpop.eup %1525 }
 0x82c   :  { %972 = vadd.xlane.f32.xlu1 %v1526_v51 }
 0x8b5   :  { %v973_v62 = vpop.xlane.xlu1 %972 }
 0x8b6   :  { %1527 = vlog2.f32 %v973_v62 }
 0x8c3   :  { %v1528_v63 = vpop.eup %1527 }
 0x8c4   :  { %v975_v1 = vmul.f32 0.6931472, %v1528_v63 }
 0x8c6   :  { %v976_v5 = vsub.f32 %v969_v61, %v975_v1 }
 0x8c8   :  { %977 = vst [vmem:[#allocation8] sm:$0xff] %v976_v5 }
 0x8c9   :  { %1580 = shalt.err (!%p1577_p0)
}
 0x8ca   :  { %987 = dma.vmem_to_hbm [thread:$0]  %s985_s11, 128, %s2077_s7, [#allocation5]  }
 0x8cb   :  { %1593 = dma.done.wait [#allocation5], 128  }
 0x8cc   :  { %1594 = vsyncadd [#allocation5], 4294967168 }
 0x8cd   :  { %991 = vsyncpa [#allocation4], 1 }
 0x8ce   :  { %992 = vsyncpa [#allocation7], 1 }
 0x8cf   :  { %993 = vsyncpa [#allocation5], 1 }

</bundles_post_ra>
